<compile_context>
chip_gen: v5e
topology: v5e:2x2
jax: 0.10.0
libtpu: 0.0.40
codegen_flags: <defaults>
</compile_context>

<pallas_src>
import functools

import jax
import jax.numpy as jnp
from jax import lax
from jax.experimental import pallas as pl
from jax.experimental.pallas import tpu as pltpu


def _layernorm(x, gamma, beta, eps=1e-5):
    # PyTorch LayerNorm: biased variance, eps inside rsqrt. All f32.
    mu = jnp.mean(x, axis=-1, keepdims=True)
    var = jnp.mean((x - mu) ** 2, axis=-1, keepdims=True)
    return (x - mu) * lax.rsqrt(var + eps) * gamma + beta


def transformer_block_kernel(
    x_ref,                      # (rows_blk, E) f32   activations (batch*seq rows)
    wqkv_ref,                   # (E, 3E)      bf16  block-diagonal packed Q|K|V
    wo_ref, bo_ref,             # (E, E) bf16, (1, E) f32
    g1_ref, b1_ref,             # (1, E) f32          LayerNorm 1
    w1_ref, bf1_ref,            # (E, F) bf16, (1, F) f32   FFN layer 1
    w2_ref, bf2_ref,            # (F, E) bf16, (1, E) f32   FFN layer 2
    g2_ref, b2_ref,             # (1, E) f32          LayerNorm 2
    o_ref,                      # (rows_blk, E) f32
    *, S, E, H,
):
    rows = x_ref.shape[0]
    Bb = rows // S              # batch elements handled by this grid step
    D = E // H
    scale = 1.0 / (float(D) ** 0.5)

    x = x_ref[...]                                   # (rows, E) f32
    x_bf = x.astype(jnp.bfloat16)

    # ---- fused Q/K/V projection: one matmul instead of 3*H tiny ones ------------
    qkv = jnp.dot(x_bf, wqkv_ref[...],
                  preferred_element_type=jnp.float32)        # (rows, 3E) f32

    # Leading-dim split back to (Bb, S, .) is sublane-tile aligned (S == 8).
    q = qkv[:, :E].reshape(Bb, S, E)
    k = qkv[:, E:2 * E].reshape(Bb, S, E)
    v = qkv[:, 2 * E:].reshape(Bb, S, E)

    # ---- attention: per-head score/PV (inherently per-head MXU work), batched over
    #      the folded batch dim; no k.T (einsum contracts last dims directly).
    head_outs = []
    for h in range(H):
        sl = slice(h * D, (h + 1) * D)
        qh = q[:, :, sl].astype(jnp.bfloat16)                # (Bb, S, D)
        kh = k[:, :, sl].astype(jnp.bfloat16)
        vh = v[:, :, sl].astype(jnp.bfloat16)
        s = jnp.einsum("bsd,btd->bst", qh, kh,
                       preferred_element_type=jnp.float32) * scale   # (Bb, S, S) f32
        s = s - jnp.max(s, axis=-1, keepdims=True)
        p = jnp.exp(s)
        # divide -> EUP reciprocal (frees the VALU slot)
        p = p * pl.reciprocal(jnp.sum(p, axis=-1, keepdims=True), approx=True)
        oh = jnp.einsum("bst,btd->bsd", p.astype(jnp.bfloat16), vh,
                        preferred_element_type=jnp.float32)
        head_outs.append(oh.astype(jnp.bfloat16))
    att = jnp.concatenate(head_outs, axis=-1).reshape(rows, E)       # bf16 (rows, E)

    # ---- output projection -------------------------------------------------------
    att = jnp.dot(att, wo_ref[...],
                  preferred_element_type=jnp.float32) + bo_ref[...]  # f32

    # ---- residual + LayerNorm 1 (dropout = identity) ------------------------------
    x1 = _layernorm(att + x, g1_ref[...], b1_ref[...])

    # ---- feed-forward: Linear -> ReLU -> Linear -----------------------------------
    h1 = jnp.dot(x1.astype(jnp.bfloat16), w1_ref[...],
                 preferred_element_type=jnp.float32) + bf1_ref[...]
    h1 = jnp.maximum(h1, 0.0)
    ff = jnp.dot(h1.astype(jnp.bfloat16), w2_ref[...],
                 preferred_element_type=jnp.float32) + bf2_ref[...]

    # ---- residual + LayerNorm 2 (dropout = identity) ------------------------------
    x2 = _layernorm(ff + x1, g2_ref[...], b2_ref[...])

    o_ref[...] = x2.astype(o_ref.dtype)


def _num_row_blocks(B):
    """1 grid step on single-TC chips (v5e/v6e); 2 parallel steps on v7x (2 TCs)."""
    try:
        kind = jax.devices()[0].device_kind.lower()
    except Exception:
        kind = ""
    two_tc = ("v7" in kind) or ("7x" in kind)
    return 2 if (two_tc and B % 2 == 0 and B >= 2) else 1


def transformer_block(x, params, *, n_heads):
    """One TransformerBlock. x: (B, S, E); params: 11 arrays (see kernel signature)."""
    B, S, E = x.shape
    wqkv, wo, bo, g1, b1, w1, bf1, w2, bf2, g2, b2 = params
    F = w1.shape[1]
    D = E // n_heads

    nb = _num_row_blocks(B)
    rows_blk = (B // nb) * S
    x2d = x.reshape(B * S, E)        # fold batch: dense matmuls see B*S rows

    kernel = functools.partial(transformer_block_kernel, S=S, E=E, H=n_heads)

    def wspec(p):
        nd = p.ndim
        return pl.BlockSpec(p.shape, lambda i, _nd=nd: (0,) * _nd)

    in_specs = [pl.BlockSpec((rows_blk, E), lambda i: (i, 0))]
    in_specs += [wspec(p) for p in params]

    rows = B * S
    flops = int(
        2 * rows * E * (3 * E)             # fused QKV projection
        + 4 * B * n_heads * S * S * D      # scores + PV
        + 2 * rows * E * E                 # output projection
        + 4 * rows * E * F                 # FFN (two linears)
    )
    transcendentals = int(B * n_heads * S * S + B * n_heads * S + 2 * rows)
    bytes_accessed = int(
        2 * x2d.size * x2d.dtype.itemsize
        + sum(int(p.size * p.dtype.itemsize) for p in params)
    )

    out2d = pl.pallas_call(
        kernel,
        out_shape=jax.ShapeDtypeStruct((B * S, E), x.dtype),
        grid=(nb,),
        in_specs=in_specs,
        out_specs=pl.BlockSpec((rows_blk, E), lambda i: (i, 0)),
        compiler_params=pltpu.CompilerParams(
            dimension_semantics=("parallel",),
        ),
        cost_estimate=pl.CostEstimate(
            flops=flops,
            transcendentals=transcendentals,
            bytes_accessed=bytes_accessed,
        ),
    )(x2d, *params)
    return out2d.reshape(B, S, E)


def init_layer_params(key, embed_size, n_heads, forward_expansion):
    D = embed_size // n_heads
    F = forward_expansion * embed_size
    ks = jax.random.split(key, 8)
    s = 0.1
    # Linear weights stored pre-transposed: (in_features, out_features).
    wq = s * jax.random.normal(ks[0], (D, D), jnp.float32)
    wk = s * jax.random.normal(ks[1], (D, D), jnp.float32)
    wv = s * jax.random.normal(ks[2], (D, D), jnp.float32)
    wo = s * jax.random.normal(ks[3], (embed_size, embed_size), jnp.float32)
    bo = s * jax.random.normal(ks[4], (1, embed_size), jnp.float32)
    w1 = s * jax.random.normal(ks[5], (embed_size, F), jnp.float32)
    bf1 = s * jax.random.normal(ks[6], (1, F), jnp.float32)
    w2 = s * jax.random.normal(ks[7], (F, embed_size), jnp.float32)
    bf2 = jnp.zeros((1, embed_size), jnp.float32)
    g1 = jnp.ones((1, embed_size), jnp.float32)
    b1 = jnp.zeros((1, embed_size), jnp.float32)
    g2 = jnp.ones((1, embed_size), jnp.float32)
    b2 = jnp.zeros((1, embed_size), jnp.float32)

    # Pack the shared per-head (D,D) q/k/v projections into one block-diagonal
    # (E, 3E) matrix: x @ kron(I_H, wq) == per-head x_h @ wq, exactly the reference's
    # single Linear(head_dim, head_dim) applied to every head.
    eye = jnp.eye(n_heads, dtype=jnp.float32)
    wqkv = jnp.concatenate(
        [jnp.kron(eye, wq), jnp.kron(eye, wk), jnp.kron(eye, wv)], axis=1)

    bf16 = lambda a: a.astype(jnp.bfloat16)   # matmul operands in bf16 (MXU-native)
    return (bf16(wqkv), bf16(wo), bo, g1, b1,
            bf16(w1), bf1, bf16(w2), bf2, g2, b2)


@functools.partial(jax.jit, static_argnames=("n_heads",))
def encoder_forward(x, layer_params, n_heads):
    # Encoder.forward: dropout(x) is identity (eval mode); each layer is applied to the
    # ORIGINAL x (reference does not re-bind x) and the last layer's output is returned.
    # Under jit, the dead (unused) layer calls are removed by XLA DCE.
    out = x
    for params in layer_params:
        out = transformer_block(x, params, n_heads=n_heads)
    return out


def _reference_block(x, params, n_heads):
    """Pure-JAX f32 reference of one TransformerBlock (for a numerical sanity check)."""
    wqkv, wo, bo, g1, b1, w1, bf1, w2, bf2, g2, b2 = (
        p.astype(jnp.float32) for p in params)
    B, S, E = x.shape
    D = E // n_heads
    qkv = jnp.einsum("bse,ef->bsf", x, wqkv)
    q, k, v = jnp.split(qkv, 3, axis=-1)
    sh = lambda t: t.reshape(B, S, n_heads, D).transpose(0, 2, 1, 3)
    q, k, v = sh(q), sh(k), sh(v)
    s = jnp.einsum("bhsd,bhtd->bhst", q, k) / jnp.sqrt(jnp.float32(D))
    p = jax.nn.softmax(s, axis=-1)
    att = jnp.einsum("bhst,bhtd->bhsd", p, v).transpose(0, 2, 1, 3).reshape(B, S, E)
    att = att @ wo + bo

    def ln(t, g, b):
        mu = jnp.mean(t, -1, keepdims=True)
        var = jnp.mean((t - mu) ** 2, -1, keepdims=True)
        return (t - mu) * lax.rsqrt(var + 1e-5) * g + b

    x1 = ln(att + x, g1, b1)
    ff = jnp.maximum(x1 @ w1 + bf1, 0.0) @ w2 + bf2
    return ln(ff + x1, g2, b2)


if __name__ == "__main__":
    embed_size = 32
    n_heads = 4
    num_layers = 2
    forward_expansion = 4
    B, S = 2, 8

    root = jax.random.PRNGKey(0)
    kx, *layer_keys = jax.random.split(root, 1 + num_layers)
    x = jax.random.normal(kx, (B, S, embed_size), jnp.float32)
    layer_params = tuple(
        init_layer_params(k, embed_size, n_heads, forward_expansion)
        for k in layer_keys
    )

    out = encoder_forward(x, layer_params, n_heads=n_heads)
    out = jax.block_until_ready(out)
    assert out.shape == (B, S, embed_size) and out.dtype == jnp.float32
    assert bool(jnp.all(jnp.isfinite(out)))

    # Numerical sanity check vs. f32 reference (loose tolerance: bf16 matmul operands).
    ref = _reference_block(x, layer_params[-1], n_heads)
    assert bool(jnp.allclose(out, ref, atol=1e-1, rtol=1e-1))

    print("KERNEL_OK")
</pallas_src>

<mosaic_0001>
module attributes {stable_mosaic.version = 11 : i64} {
  func.func @transformer_block_kernel(%arg0: i32, %arg1: memref<16x32xf32, #tpu.memory_space<vmem>>, %arg2: memref<32x96xbf16, #tpu.memory_space<vmem>>, %arg3: memref<32x32xbf16, #tpu.memory_space<vmem>>, %arg4: memref<1x32xf32, #tpu.memory_space<vmem>>, %arg5: memref<1x32xf32, #tpu.memory_space<vmem>>, %arg6: memref<1x32xf32, #tpu.memory_space<vmem>>, %arg7: memref<32x128xbf16, #tpu.memory_space<vmem>>, %arg8: memref<1x128xf32, #tpu.memory_space<vmem>>, %arg9: memref<128x32xbf16, #tpu.memory_space<vmem>>, %arg10: memref<1x32xf32, #tpu.memory_space<vmem>>, %arg11: memref<1x32xf32, #tpu.memory_space<vmem>>, %arg12: memref<1x32xf32, #tpu.memory_space<vmem>>, %arg13: memref<16x32xf32, #tpu.memory_space<vmem>>) attributes {dimension_semantics = [#tpu.dimension_semantics<parallel>], iteration_bounds = array<i64: 1>, scalar_prefetch = 0 : i64, scratch_operands = 0 : i64, tpu.core_type = #tpu.core_type<tc>, window_params = [{transform_indices = @transform_0, window_bounds = array<i64: 16, 32>}, {pipeline_mode = #tpu.pipeline_mode<synchronous>, transform_indices = @transform_1, window_bounds = array<i64: 32, 96>}, {pipeline_mode = #tpu.pipeline_mode<synchronous>, transform_indices = @transform_2, window_bounds = array<i64: 32, 32>}, {pipeline_mode = #tpu.pipeline_mode<synchronous>, transform_indices = @transform_3, window_bounds = array<i64: 1, 32>}, {pipeline_mode = #tpu.pipeline_mode<synchronous>, transform_indices = @transform_4, window_bounds = array<i64: 1, 32>}, {pipeline_mode = #tpu.pipeline_mode<synchronous>, transform_indices = @transform_5, window_bounds = array<i64: 1, 32>}, {pipeline_mode = #tpu.pipeline_mode<synchronous>, transform_indices = @transform_6, window_bounds = array<i64: 32, 128>}, {pipeline_mode = #tpu.pipeline_mode<synchronous>, transform_indices = @transform_7, window_bounds = array<i64: 1, 128>}, {pipeline_mode = #tpu.pipeline_mode<synchronous>, transform_indices = @transform_8, window_bounds = array<i64: 128, 32>}, {pipeline_mode = #tpu.pipeline_mode<synchronous>, transform_indices = @transform_9, window_bounds = array<i64: 1, 32>}, {pipeline_mode = #tpu.pipeline_mode<synchronous>, transform_indices = @transform_10, window_bounds = array<i64: 1, 32>}, {pipeline_mode = #tpu.pipeline_mode<synchronous>, transform_indices = @transform_11, window_bounds = array<i64: 1, 32>}, {transform_indices = @transform_12, window_bounds = array<i64: 16, 32>}]} {
    %c0 = arith.constant 0 : index
    %c0_0 = arith.constant 0 : index
    %0 = vector.load %arg1[%c0, %c0_0] : memref<16x32xf32, #tpu.memory_space<vmem>>, vector<16x32xf32>
    %1 = arith.truncf %0 : vector<16x32xf32> to vector<16x32xbf16>
    %c0_1 = arith.constant 0 : index
    %c0_2 = arith.constant 0 : index
    %2 = vector.load %arg2[%c0_1, %c0_2] : memref<32x96xbf16, #tpu.memory_space<vmem>>, vector<32x96xbf16>
    %cst = arith.constant dense<0.000000e+00> : vector<16x96xf32>
    %3 = tpu.matmul %1, %2, %cst {dimension_numbers = #tpu.dot_dimension_numbers<[1], [0], [0], [1], [0, 0, 1, 1], [], []>} : vector<16x32xbf16>, vector<32x96xbf16>, vector<16x96xf32> -> vector<16x96xf32>
    %4 = vector.extract_strided_slice %3 {offsets = [0, 0], sizes = [16, 32], strides = [1, 1]} : vector<16x96xf32> to vector<16x32xf32>
    %5 = vector.shape_cast %4 : vector<16x32xf32> to vector<2x8x32xf32>
    %6 = vector.extract_strided_slice %3 {offsets = [0, 32], sizes = [16, 32], strides = [1, 1]} : vector<16x96xf32> to vector<16x32xf32>
    %7 = vector.shape_cast %6 : vector<16x32xf32> to vector<2x8x32xf32>
    %8 = vector.extract_strided_slice %3 {offsets = [0, 64], sizes = [16, 32], strides = [1, 1]} : vector<16x96xf32> to vector<16x32xf32>
    %9 = vector.shape_cast %8 : vector<16x32xf32> to vector<2x8x32xf32>
    %10 = vector.extract_strided_slice %5 {offsets = [0, 0, 0], sizes = [2, 8, 8], strides = [1, 1, 1]} : vector<2x8x32xf32> to vector<2x8x8xf32>
    %11 = arith.truncf %10 : vector<2x8x8xf32> to vector<2x8x8xbf16>
    %12 = vector.extract_strided_slice %7 {offsets = [0, 0, 0], sizes = [2, 8, 8], strides = [1, 1, 1]} : vector<2x8x32xf32> to vector<2x8x8xf32>
    %13 = arith.truncf %12 : vector<2x8x8xf32> to vector<2x8x8xbf16>
    %14 = vector.extract_strided_slice %9 {offsets = [0, 0, 0], sizes = [2, 8, 8], strides = [1, 1, 1]} : vector<2x8x32xf32> to vector<2x8x8xf32>
    %15 = arith.truncf %14 : vector<2x8x8xf32> to vector<2x8x8xbf16>
    "tpu.trace_start"() <{level = 10 : i32, message = "bsd,btd->bst"}> : () -> ()
    %cst_3 = arith.constant dense<0.000000e+00> : vector<2x8x8xf32>
    %16 = tpu.matmul %11, %13, %cst_3 {dimension_numbers = #tpu.dot_dimension_numbers<[2], [2], [1], [1], [0, 0, 0, 1, 1, 1], [0], [0]>} : vector<2x8x8xbf16>, vector<2x8x8xbf16>, vector<2x8x8xf32> -> vector<2x8x8xf32>
    "tpu.trace_stop"() : () -> ()
    %cst_4 = arith.constant 0.353553385 : f32
    %17 = vector.broadcast %cst_4 : f32 to vector<2x8x8xf32>
    %18 = arith.mulf %16, %17 : vector<2x8x8xf32>
    %cst_5 = arith.constant dense<0xFF800000> : vector<2x8xf32>
    %19 = vector.multi_reduction <maximumf>, %18, %cst_5 [2] : vector<2x8x8xf32> to vector<2x8xf32>
    %20 = vector.shape_cast %19 : vector<2x8xf32> to vector<2x8x1xf32>
    %21 = vector.broadcast %20 : vector<2x8x1xf32> to vector<2x8x8xf32>
    %22 = arith.subf %18, %21 : vector<2x8x8xf32>
    %23 = math.exp %22 : vector<2x8x8xf32>
    %cst_6 = arith.constant dense<0.000000e+00> : vector<2x8xf32>
    %24 = vector.multi_reduction <add>, %23, %cst_6 [2] : vector<2x8x8xf32> to vector<2x8xf32>
    %25 = vector.shape_cast %24 : vector<2x8xf32> to vector<2x8x1xf32>
    %26 = tpu.reciprocal %25 {approx = true} : vector<2x8x1xf32> -> vector<2x8x1xf32>
    %27 = vector.broadcast %26 : vector<2x8x1xf32> to vector<2x8x8xf32>
    %28 = arith.mulf %23, %27 : vector<2x8x8xf32>
    %29 = arith.truncf %28 : vector<2x8x8xf32> to vector<2x8x8xbf16>
    "tpu.trace_start"() <{level = 10 : i32, message = "bst,btd->bsd"}> : () -> ()
    %cst_7 = arith.constant dense<0.000000e+00> : vector<2x8x8xf32>
    %30 = tpu.matmul %29, %15, %cst_7 {dimension_numbers = #tpu.dot_dimension_numbers<[2], [1], [1], [2], [0, 0, 0, 1, 1, 2], [0], [0]>} : vector<2x8x8xbf16>, vector<2x8x8xbf16>, vector<2x8x8xf32> -> vector<2x8x8xf32>
    "tpu.trace_stop"() : () -> ()
    %31 = arith.truncf %30 : vector<2x8x8xf32> to vector<2x8x8xbf16>
    %32 = vector.extract_strided_slice %5 {offsets = [0, 0, 8], sizes = [2, 8, 8], strides = [1, 1, 1]} : vector<2x8x32xf32> to vector<2x8x8xf32>
    %33 = arith.truncf %32 : vector<2x8x8xf32> to vector<2x8x8xbf16>
    %34 = vector.extract_strided_slice %7 {offsets = [0, 0, 8], sizes = [2, 8, 8], strides = [1, 1, 1]} : vector<2x8x32xf32> to vector<2x8x8xf32>
    %35 = arith.truncf %34 : vector<2x8x8xf32> to vector<2x8x8xbf16>
    %36 = vector.extract_strided_slice %9 {offsets = [0, 0, 8], sizes = [2, 8, 8], strides = [1, 1, 1]} : vector<2x8x32xf32> to vector<2x8x8xf32>
    %37 = arith.truncf %36 : vector<2x8x8xf32> to vector<2x8x8xbf16>
    "tpu.trace_start"() <{level = 10 : i32, message = "bsd,btd->bst"}> : () -> ()
    %cst_8 = arith.constant dense<0.000000e+00> : vector<2x8x8xf32>
    %38 = tpu.matmul %33, %35, %cst_8 {dimension_numbers = #tpu.dot_dimension_numbers<[2], [2], [1], [1], [0, 0, 0, 1, 1, 1], [0], [0]>} : vector<2x8x8xbf16>, vector<2x8x8xbf16>, vector<2x8x8xf32> -> vector<2x8x8xf32>
    "tpu.trace_stop"() : () -> ()
    %cst_9 = arith.constant 0.353553385 : f32
    %39 = vector.broadcast %cst_9 : f32 to vector<2x8x8xf32>
    %40 = arith.mulf %38, %39 : vector<2x8x8xf32>
    %cst_10 = arith.constant dense<0xFF800000> : vector<2x8xf32>
    %41 = vector.multi_reduction <maximumf>, %40, %cst_10 [2] : vector<2x8x8xf32> to vector<2x8xf32>
    %42 = vector.shape_cast %41 : vector<2x8xf32> to vector<2x8x1xf32>
    %43 = vector.broadcast %42 : vector<2x8x1xf32> to vector<2x8x8xf32>
    %44 = arith.subf %40, %43 : vector<2x8x8xf32>
    %45 = math.exp %44 : vector<2x8x8xf32>
    %cst_11 = arith.constant dense<0.000000e+00> : vector<2x8xf32>
    %46 = vector.multi_reduction <add>, %45, %cst_11 [2] : vector<2x8x8xf32> to vector<2x8xf32>
    %47 = vector.shape_cast %46 : vector<2x8xf32> to vector<2x8x1xf32>
    %48 = tpu.reciprocal %47 {approx = true} : vector<2x8x1xf32> -> vector<2x8x1xf32>
    %49 = vector.broadcast %48 : vector<2x8x1xf32> to vector<2x8x8xf32>
    %50 = arith.mulf %45, %49 : vector<2x8x8xf32>
    %51 = arith.truncf %50 : vector<2x8x8xf32> to vector<2x8x8xbf16>
    "tpu.trace_start"() <{level = 10 : i32, message = "bst,btd->bsd"}> : () -> ()
    %cst_12 = arith.constant dense<0.000000e+00> : vector<2x8x8xf32>
    %52 = tpu.matmul %51, %37, %cst_12 {dimension_numbers = #tpu.dot_dimension_numbers<[2], [1], [1], [2], [0, 0, 0, 1, 1, 2], [0], [0]>} : vector<2x8x8xbf16>, vector<2x8x8xbf16>, vector<2x8x8xf32> -> vector<2x8x8xf32>
    "tpu.trace_stop"() : () -> ()
    %53 = arith.truncf %52 : vector<2x8x8xf32> to vector<2x8x8xbf16>
    %54 = vector.extract_strided_slice %5 {offsets = [0, 0, 16], sizes = [2, 8, 8], strides = [1, 1, 1]} : vector<2x8x32xf32> to vector<2x8x8xf32>
    %55 = arith.truncf %54 : vector<2x8x8xf32> to vector<2x8x8xbf16>
    %56 = vector.extract_strided_slice %7 {offsets = [0, 0, 16], sizes = [2, 8, 8], strides = [1, 1, 1]} : vector<2x8x32xf32> to vector<2x8x8xf32>
    %57 = arith.truncf %56 : vector<2x8x8xf32> to vector<2x8x8xbf16>
    %58 = vector.extract_strided_slice %9 {offsets = [0, 0, 16], sizes = [2, 8, 8], strides = [1, 1, 1]} : vector<2x8x32xf32> to vector<2x8x8xf32>
    %59 = arith.truncf %58 : vector<2x8x8xf32> to vector<2x8x8xbf16>
    "tpu.trace_start"() <{level = 10 : i32, message = "bsd,btd->bst"}> : () -> ()
    %cst_13 = arith.constant dense<0.000000e+00> : vector<2x8x8xf32>
    %60 = tpu.matmul %55, %57, %cst_13 {dimension_numbers = #tpu.dot_dimension_numbers<[2], [2], [1], [1], [0, 0, 0, 1, 1, 1], [0], [0]>} : vector<2x8x8xbf16>, vector<2x8x8xbf16>, vector<2x8x8xf32> -> vector<2x8x8xf32>
    "tpu.trace_stop"() : () -> ()
    %cst_14 = arith.constant 0.353553385 : f32
    %61 = vector.broadcast %cst_14 : f32 to vector<2x8x8xf32>
    %62 = arith.mulf %60, %61 : vector<2x8x8xf32>
    %cst_15 = arith.constant dense<0xFF800000> : vector<2x8xf32>
    %63 = vector.multi_reduction <maximumf>, %62, %cst_15 [2] : vector<2x8x8xf32> to vector<2x8xf32>
    %64 = vector.shape_cast %63 : vector<2x8xf32> to vector<2x8x1xf32>
    %65 = vector.broadcast %64 : vector<2x8x1xf32> to vector<2x8x8xf32>
    %66 = arith.subf %62, %65 : vector<2x8x8xf32>
    %67 = math.exp %66 : vector<2x8x8xf32>
    %cst_16 = arith.constant dense<0.000000e+00> : vector<2x8xf32>
    %68 = vector.multi_reduction <add>, %67, %cst_16 [2] : vector<2x8x8xf32> to vector<2x8xf32>
    %69 = vector.shape_cast %68 : vector<2x8xf32> to vector<2x8x1xf32>
    %70 = tpu.reciprocal %69 {approx = true} : vector<2x8x1xf32> -> vector<2x8x1xf32>
    %71 = vector.broadcast %70 : vector<2x8x1xf32> to vector<2x8x8xf32>
    %72 = arith.mulf %67, %71 : vector<2x8x8xf32>
    %73 = arith.truncf %72 : vector<2x8x8xf32> to vector<2x8x8xbf16>
    "tpu.trace_start"() <{level = 10 : i32, message = "bst,btd->bsd"}> : () -> ()
    %cst_17 = arith.constant dense<0.000000e+00> : vector<2x8x8xf32>
    %74 = tpu.matmul %73, %59, %cst_17 {dimension_numbers = #tpu.dot_dimension_numbers<[2], [1], [1], [2], [0, 0, 0, 1, 1, 2], [0], [0]>} : vector<2x8x8xbf16>, vector<2x8x8xbf16>, vector<2x8x8xf32> -> vector<2x8x8xf32>
    "tpu.trace_stop"() : () -> ()
    %75 = arith.truncf %74 : vector<2x8x8xf32> to vector<2x8x8xbf16>
    %76 = vector.extract_strided_slice %5 {offsets = [0, 0, 24], sizes = [2, 8, 8], strides = [1, 1, 1]} : vector<2x8x32xf32> to vector<2x8x8xf32>
    %77 = arith.truncf %76 : vector<2x8x8xf32> to vector<2x8x8xbf16>
    %78 = vector.extract_strided_slice %7 {offsets = [0, 0, 24], sizes = [2, 8, 8], strides = [1, 1, 1]} : vector<2x8x32xf32> to vector<2x8x8xf32>
    %79 = arith.truncf %78 : vector<2x8x8xf32> to vector<2x8x8xbf16>
    %80 = vector.extract_strided_slice %9 {offsets = [0, 0, 24], sizes = [2, 8, 8], strides = [1, 1, 1]} : vector<2x8x32xf32> to vector<2x8x8xf32>
    %81 = arith.truncf %80 : vector<2x8x8xf32> to vector<2x8x8xbf16>
    "tpu.trace_start"() <{level = 10 : i32, message = "bsd,btd->bst"}> : () -> ()
    %cst_18 = arith.constant dense<0.000000e+00> : vector<2x8x8xf32>
    %82 = tpu.matmul %77, %79, %cst_18 {dimension_numbers = #tpu.dot_dimension_numbers<[2], [2], [1], [1], [0, 0, 0, 1, 1, 1], [0], [0]>} : vector<2x8x8xbf16>, vector<2x8x8xbf16>, vector<2x8x8xf32> -> vector<2x8x8xf32>
    "tpu.trace_stop"() : () -> ()
    %cst_19 = arith.constant 0.353553385 : f32
    %83 = vector.broadcast %cst_19 : f32 to vector<2x8x8xf32>
    %84 = arith.mulf %82, %83 : vector<2x8x8xf32>
    %cst_20 = arith.constant dense<0xFF800000> : vector<2x8xf32>
    %85 = vector.multi_reduction <maximumf>, %84, %cst_20 [2] : vector<2x8x8xf32> to vector<2x8xf32>
    %86 = vector.shape_cast %85 : vector<2x8xf32> to vector<2x8x1xf32>
    %87 = vector.broadcast %86 : vector<2x8x1xf32> to vector<2x8x8xf32>
    %88 = arith.subf %84, %87 : vector<2x8x8xf32>
    %89 = math.exp %88 : vector<2x8x8xf32>
    %cst_21 = arith.constant dense<0.000000e+00> : vector<2x8xf32>
    %90 = vector.multi_reduction <add>, %89, %cst_21 [2] : vector<2x8x8xf32> to vector<2x8xf32>
    %91 = vector.shape_cast %90 : vector<2x8xf32> to vector<2x8x1xf32>
    %92 = tpu.reciprocal %91 {approx = true} : vector<2x8x1xf32> -> vector<2x8x1xf32>
    %93 = vector.broadcast %92 : vector<2x8x1xf32> to vector<2x8x8xf32>
    %94 = arith.mulf %89, %93 : vector<2x8x8xf32>
    %95 = arith.truncf %94 : vector<2x8x8xf32> to vector<2x8x8xbf16>
    "tpu.trace_start"() <{level = 10 : i32, message = "bst,btd->bsd"}> : () -> ()
    %cst_22 = arith.constant dense<0.000000e+00> : vector<2x8x8xf32>
    %96 = tpu.matmul %95, %81, %cst_22 {dimension_numbers = #tpu.dot_dimension_numbers<[2], [1], [1], [2], [0, 0, 0, 1, 1, 2], [0], [0]>} : vector<2x8x8xbf16>, vector<2x8x8xbf16>, vector<2x8x8xf32> -> vector<2x8x8xf32>
    "tpu.trace_stop"() : () -> ()
    %97 = arith.truncf %96 : vector<2x8x8xf32> to vector<2x8x8xbf16>
    %98 = tpu.concatenate %31, %53, %75, %97 in 2 : vector<2x8x8xbf16>, vector<2x8x8xbf16>, vector<2x8x8xbf16>, vector<2x8x8xbf16> -> vector<2x8x32xbf16>
    %99 = vector.shape_cast %98 : vector<2x8x32xbf16> to vector<16x32xbf16>
    %c0_23 = arith.constant 0 : index
    %c0_24 = arith.constant 0 : index
    %100 = vector.load %arg3[%c0_23, %c0_24] : memref<32x32xbf16, #tpu.memory_space<vmem>>, vector<32x32xbf16>
    %cst_25 = arith.constant dense<0.000000e+00> : vector<16x32xf32>
    %101 = tpu.matmul %99, %100, %cst_25 {dimension_numbers = #tpu.dot_dimension_numbers<[1], [0], [0], [1], [0, 0, 1, 1], [], []>} : vector<16x32xbf16>, vector<32x32xbf16>, vector<16x32xf32> -> vector<16x32xf32>
    %c0_26 = arith.constant 0 : index
    %c0_27 = arith.constant 0 : index
    %102 = vector.load %arg4[%c0_26, %c0_27] : memref<1x32xf32, #tpu.memory_space<vmem>>, vector<1x32xf32>
    %103 = vector.broadcast %102 : vector<1x32xf32> to vector<16x32xf32>
    %104 = arith.addf %101, %103 : vector<16x32xf32>
    %105 = arith.addf %104, %0 : vector<16x32xf32>
    %c0_28 = arith.constant 0 : index
    %c0_29 = arith.constant 0 : index
    %106 = vector.load %arg5[%c0_28, %c0_29] : memref<1x32xf32, #tpu.memory_space<vmem>>, vector<1x32xf32>
    %c0_30 = arith.constant 0 : index
    %c0_31 = arith.constant 0 : index
    %107 = vector.load %arg6[%c0_30, %c0_31] : memref<1x32xf32, #tpu.memory_space<vmem>>, vector<1x32xf32>
    %cst_32 = arith.constant dense<0.000000e+00> : vector<16xf32>
    %108 = vector.multi_reduction <add>, %105, %cst_32 [1] : vector<16x32xf32> to vector<16xf32>
    %109 = vector.shape_cast %108 : vector<16xf32> to vector<16x1xf32>
    %cst_33 = arith.constant 3.200000e+01 : f32
    %110 = vector.broadcast %cst_33 : f32 to vector<16x1xf32>
    %111 = arith.divf %109, %110 : vector<16x1xf32>
    %112 = vector.broadcast %111 : vector<16x1xf32> to vector<16x32xf32>
    %113 = arith.subf %105, %112 : vector<16x32xf32>
    %114 = arith.mulf %113, %113 : vector<16x32xf32>
    %cst_34 = arith.constant dense<0.000000e+00> : vector<16xf32>
    %115 = vector.multi_reduction <add>, %114, %cst_34 [1] : vector<16x32xf32> to vector<16xf32>
    %116 = vector.shape_cast %115 : vector<16xf32> to vector<16x1xf32>
    %cst_35 = arith.constant 3.200000e+01 : f32
    %117 = vector.broadcast %cst_35 : f32 to vector<16x1xf32>
    %118 = arith.divf %116, %117 : vector<16x1xf32>
    %119 = vector.broadcast %111 : vector<16x1xf32> to vector<16x32xf32>
    %120 = arith.subf %105, %119 : vector<16x32xf32>
    %cst_36 = arith.constant 9.99999974E-6 : f32
    %121 = vector.broadcast %cst_36 : f32 to vector<16x1xf32>
    %122 = arith.addf %118, %121 : vector<16x1xf32>
    %123 = math.rsqrt %122 : vector<16x1xf32>
    %124 = vector.broadcast %123 : vector<16x1xf32> to vector<16x32xf32>
    %125 = arith.mulf %120, %124 : vector<16x32xf32>
    %126 = vector.broadcast %106 : vector<1x32xf32> to vector<16x32xf32>
    %127 = arith.mulf %125, %126 : vector<16x32xf32>
    %128 = vector.broadcast %107 : vector<1x32xf32> to vector<16x32xf32>
    %129 = arith.addf %127, %128 : vector<16x32xf32>
    %130 = arith.truncf %129 : vector<16x32xf32> to vector<16x32xbf16>
    %c0_37 = arith.constant 0 : index
    %c0_38 = arith.constant 0 : index
    %131 = vector.load %arg7[%c0_37, %c0_38] : memref<32x128xbf16, #tpu.memory_space<vmem>>, vector<32x128xbf16>
    %cst_39 = arith.constant dense<0.000000e+00> : vector<16x128xf32>
    %132 = tpu.matmul %130, %131, %cst_39 {dimension_numbers = #tpu.dot_dimension_numbers<[1], [0], [0], [1], [0, 0, 1, 1], [], []>} : vector<16x32xbf16>, vector<32x128xbf16>, vector<16x128xf32> -> vector<16x128xf32>
    %c0_40 = arith.constant 0 : index
    %c0_41 = arith.constant 0 : index
    %133 = vector.load %arg8[%c0_40, %c0_41] : memref<1x128xf32, #tpu.memory_space<vmem>>, vector<1x128xf32>
    %134 = vector.broadcast %133 : vector<1x128xf32> to vector<16x128xf32>
    %135 = arith.addf %132, %134 : vector<16x128xf32>
    %cst_42 = arith.constant 0.000000e+00 : f32
    %136 = vector.broadcast %cst_42 : f32 to vector<16x128xf32>
    %137 = arith.maximumf %135, %136 : vector<16x128xf32>
    %138 = arith.truncf %137 : vector<16x128xf32> to vector<16x128xbf16>
    %c0_43 = arith.constant 0 : index
    %c0_44 = arith.constant 0 : index
    %139 = vector.load %arg9[%c0_43, %c0_44] : memref<128x32xbf16, #tpu.memory_space<vmem>>, vector<128x32xbf16>
    %cst_45 = arith.constant dense<0.000000e+00> : vector<16x32xf32>
    %140 = tpu.matmul %138, %139, %cst_45 {dimension_numbers = #tpu.dot_dimension_numbers<[1], [0], [0], [1], [0, 0, 1, 1], [], []>} : vector<16x128xbf16>, vector<128x32xbf16>, vector<16x32xf32> -> vector<16x32xf32>
    %c0_46 = arith.constant 0 : index
    %c0_47 = arith.constant 0 : index
    %141 = vector.load %arg10[%c0_46, %c0_47] : memref<1x32xf32, #tpu.memory_space<vmem>>, vector<1x32xf32>
    %142 = vector.broadcast %141 : vector<1x32xf32> to vector<16x32xf32>
    %143 = arith.addf %140, %142 : vector<16x32xf32>
    %144 = arith.addf %143, %129 : vector<16x32xf32>
    %c0_48 = arith.constant 0 : index
    %c0_49 = arith.constant 0 : index
    %145 = vector.load %arg11[%c0_48, %c0_49] : memref<1x32xf32, #tpu.memory_space<vmem>>, vector<1x32xf32>
    %c0_50 = arith.constant 0 : index
    %c0_51 = arith.constant 0 : index
    %146 = vector.load %arg12[%c0_50, %c0_51] : memref<1x32xf32, #tpu.memory_space<vmem>>, vector<1x32xf32>
    %cst_52 = arith.constant dense<0.000000e+00> : vector<16xf32>
    %147 = vector.multi_reduction <add>, %144, %cst_52 [1] : vector<16x32xf32> to vector<16xf32>
    %148 = vector.shape_cast %147 : vector<16xf32> to vector<16x1xf32>
    %cst_53 = arith.constant 3.200000e+01 : f32
    %149 = vector.broadcast %cst_53 : f32 to vector<16x1xf32>
    %150 = arith.divf %148, %149 : vector<16x1xf32>
    %151 = vector.broadcast %150 : vector<16x1xf32> to vector<16x32xf32>
    %152 = arith.subf %144, %151 : vector<16x32xf32>
    %153 = arith.mulf %152, %152 : vector<16x32xf32>
    %cst_54 = arith.constant dense<0.000000e+00> : vector<16xf32>
    %154 = vector.multi_reduction <add>, %153, %cst_54 [1] : vector<16x32xf32> to vector<16xf32>
    %155 = vector.shape_cast %154 : vector<16xf32> to vector<16x1xf32>
    %cst_55 = arith.constant 3.200000e+01 : f32
    %156 = vector.broadcast %cst_55 : f32 to vector<16x1xf32>
    %157 = arith.divf %155, %156 : vector<16x1xf32>
    %158 = vector.broadcast %150 : vector<16x1xf32> to vector<16x32xf32>
    %159 = arith.subf %144, %158 : vector<16x32xf32>
    %cst_56 = arith.constant 9.99999974E-6 : f32
    %160 = vector.broadcast %cst_56 : f32 to vector<16x1xf32>
    %161 = arith.addf %157, %160 : vector<16x1xf32>
    %162 = math.rsqrt %161 : vector<16x1xf32>
    %163 = vector.broadcast %162 : vector<16x1xf32> to vector<16x32xf32>
    %164 = arith.mulf %159, %163 : vector<16x32xf32>
    %165 = vector.broadcast %145 : vector<1x32xf32> to vector<16x32xf32>
    %166 = arith.mulf %164, %165 : vector<16x32xf32>
    %167 = vector.broadcast %146 : vector<1x32xf32> to vector<16x32xf32>
    %168 = arith.addf %166, %167 : vector<16x32xf32>
    %c0_57 = arith.constant 0 : index
    %c0_58 = arith.constant 0 : index
    %169 = vector.load %arg13[%c0_57, %c0_58] : memref<16x32xf32, #tpu.memory_space<vmem>>, vector<16x32xf32>
    tpu.vector_store %arg13[%c0_57, %c0_58], %168 {strides = array<i32>} : memref<16x32xf32, #tpu.memory_space<vmem>>, vector<16x32xf32>,
    return
  }
  func.func @transform_0(%arg0: i32) -> (i32, i32) {
    %c0_i32 = arith.constant 0 : i32
    %c0_i32_0 = arith.constant 0 : i32
    return %arg0, %c0_i32 : i32, i32
  }
  func.func @transform_1(%arg0: i32) -> (i32, i32) {
    %c0_i32 = arith.constant 0 : i32
    %c0_i32_0 = arith.constant 0 : i32
    %c0_i32_1 = arith.constant 0 : i32
    return %c0_i32, %c0_i32_0 : i32, i32
  }
  func.func @transform_2(%arg0: i32) -> (i32, i32) {
    %c0_i32 = arith.constant 0 : i32
    %c0_i32_0 = arith.constant 0 : i32
    %c0_i32_1 = arith.constant 0 : i32
    return %c0_i32, %c0_i32_0 : i32, i32
  }
  func.func @transform_3(%arg0: i32) -> (i32, i32) {
    %c0_i32 = arith.constant 0 : i32
    %c0_i32_0 = arith.constant 0 : i32
    %c0_i32_1 = arith.constant 0 : i32
    return %c0_i32, %c0_i32_0 : i32, i32
  }
  func.func @transform_4(%arg0: i32) -> (i32, i32) {
    %c0_i32 = arith.constant 0 : i32
    %c0_i32_0 = arith.constant 0 : i32
    %c0_i32_1 = arith.constant 0 : i32
    return %c0_i32, %c0_i32_0 : i32, i32
  }
  func.func @transform_5(%arg0: i32) -> (i32, i32) {
    %c0_i32 = arith.constant 0 : i32
    %c0_i32_0 = arith.constant 0 : i32
    %c0_i32_1 = arith.constant 0 : i32
    return %c0_i32, %c0_i32_0 : i32, i32
  }
  func.func @transform_6(%arg0: i32) -> (i32, i32) {
    %c0_i32 = arith.constant 0 : i32
    %c0_i32_0 = arith.constant 0 : i32
    %c0_i32_1 = arith.constant 0 : i32
    return %c0_i32, %c0_i32_0 : i32, i32
  }
  func.func @transform_7(%arg0: i32) -> (i32, i32) {
    %c0_i32 = arith.constant 0 : i32
    %c0_i32_0 = arith.constant 0 : i32
    %c0_i32_1 = arith.constant 0 : i32
    return %c0_i32, %c0_i32_0 : i32, i32
  }
  func.func @transform_8(%arg0: i32) -> (i32, i32) {
    %c0_i32 = arith.constant 0 : i32
    %c0_i32_0 = arith.constant 0 : i32
    %c0_i32_1 = arith.constant 0 : i32
    return %c0_i32, %c0_i32_0 : i32, i32
  }
  func.func @transform_9(%arg0: i32) -> (i32, i32) {
    %c0_i32 = arith.constant 0 : i32
    %c0_i32_0 = arith.constant 0 : i32
    %c0_i32_1 = arith.constant 0 : i32
    return %c0_i32, %c0_i32_0 : i32, i32
  }
  func.func @transform_10(%arg0: i32) -> (i32, i32) {
    %c0_i32 = arith.constant 0 : i32
    %c0_i32_0 = arith.constant 0 : i32
    %c0_i32_1 = arith.constant 0 : i32
    return %c0_i32, %c0_i32_0 : i32, i32
  }
  func.func @transform_11(%arg0: i32) -> (i32, i32) {
    %c0_i32 = arith.constant 0 : i32
    %c0_i32_0 = arith.constant 0 : i32
    %c0_i32_1 = arith.constant 0 : i32
    return %c0_i32, %c0_i32_0 : i32, i32
  }
  func.func @transform_12(%arg0: i32) -> (i32, i32) {
    %c0_i32 = arith.constant 0 : i32
    %c0_i32_0 = arith.constant 0 : i32
    return %arg0, %c0_i32 : i32, i32
  }
}

</mosaic_0001>

<bundles_post_ra>
// kernel: encoder_forward.1
= control target key start
LH: loop header
LB: loop body
LE: loop exit
PB: predicated region body
PF: predicated region fallthrough
CT: control target
= control target key end

     0   :  { %s1391_s0 = inlined_call_operand.vmem [shape: f32[16,32], index: 0, kind: input, shape index: {}]   ;;  %s1392_s1 = inlined_call_operand.vmem [shape: bf16[32,96], index: 1, kind: input, shape index: {}]   ;;  %s1393_s2 = inlined_call_operand.vmem [shape: bf16[32,32], index: 2, kind: input, shape index: {}]   ;;  %s1394_s3 = inlined_call_operand.vmem [shape: f32[1,32], index: 3, kind: input, shape index: {}]   ;;  %s1395_s4 = inlined_call_operand.vmem [shape: f32[1,32], index: 4, kind: input, shape index: {}]   ;;  %s1396_s5 = inlined_call_operand.vmem [shape: f32[1,32], index: 5, kind: input, shape index: {}]   ;;  %s1397_s6 = inlined_call_operand.vmem [shape: bf16[32,128], index: 6, kind: input, shape index: {}]   ;;  %s1398_s7 = inlined_call_operand.vmem [shape: f32[1,128], index: 7, kind: input, shape index: {}]   ;;  %s1399_s8 = inlined_call_operand.vmem [shape: bf16[128,32], index: 8, kind: input, shape index: {}]   ;;  %s1400_s9 = inlined_call_operand.vmem [shape: f32[1,32], index: 9, kind: input, shape index: {}]   ;;  %s1401_s10 = inlined_call_operand.vmem [shape: f32[1,32], index: 10, kind: input, shape index: {}]   ;;  %s1402_s11 = inlined_call_operand.vmem [shape: f32[1,32], index: 11, kind: input, shape index: {}]   ;;  %s1403_s12 = inlined_call_operand.hbm [shape: f32[16,32], index: 12, kind: output, shape index: {}]  }
   0x1   :  { %v980_v0 = vld [vmem:[%s1392_s1 + $0x8] sm:$0xff]  ;;  %v979_v1 = vld [vmem:[%s1392_s1] sm:$0xff] }
   0x2   :  { %v1176_v2 = vld [vmem:[%s1391_s0] sm:$0xff]  ;;  %v1181_v3 = vld [vmem:[%s1391_s0 + $0x8] sm:$0xff]  ;;  %72 = vmatpush.bf16.msra.mxu0 %v980_v0 }
   0x3   :  { %17 = vsyncpa [#allocation3], 0  ;;  %v45_v4 = vpack.c.bf16 %v1181_v3, %v1176_v2  ;;  %vm62_vm0 = vcmask 261120   ;;  %s1085_s1 = smov 88   ;;  %s1086_s29 = smov 96   ;;  %vm87_vm1 = vcmask 64512  }
   0x4   :  { %s1087_s0 = smov 120   ;;  %s1088_s30 = smov 80   ;;  %vm162_vm2 = vcmask 1043456   ;;  %vm586_vm3 = vcmask 130048   ;;  %vm591_vm4 = vcmask 195584  }
   0x5   :  { %s1089_s13 = smov 72   ;;  %s1090_s14 = smov 112  }
   0x6   :  { %73 = vmatpush.bf16.msra.mxu0 %v979_v1  ;;  %s1091_s15 = smov 104   ;;  %s1092_s16 = smov 64  }
   0x7   :  { %s1093_s17 = smov 56   ;;  %s1094_s18 = smov 48  }
   0x8   :  { %s1095_s19 = smov 40   ;;  %s1096_s20 = smov 16  }
   0x9   :  { %912 = vmatmul.msk.bf16.vlgmr.msra.gmra.mxu0 %vm62_vm0, %v45_v4  ;;  %s1097_s21 = smov 8   ;;  %s1098_s22 = smov 24  }
  0x86   :  { %v75_v5 = vpop.f32.mrf.mxu0 }
  0x87   :  { %v80_v6 = vpack.c.bf16 %v75_v5, %v75_v5 }
  0x89   :  { %v83_v7 = vunpack.c.l.b16 %v80_v6 }
  0x8b   :  { %v1186_v8 = vpack.c.b16 %v83_v7, %v83_v7 }
  0x8d   :  { %204 = vrot.lane.b32.xlu1 %v1186_v8, %s1085_s1  ;;  %85 = vrot.lane.b32.xlu0 %v1186_v8, %s1086_s29 }
  0x8e   :  { %v77_v9 = vpop.f32.mrf.mxu0 }
  0x8f   :  { %v81_v10 = vpack.c.bf16 %v77_v9, %v77_v9 }
  0x91   :  { %v108_v11 = vunpack.c.l.b16 %v81_v10 }
  0x93   :  { %v1190_v12 = vpack.c.b16 %v108_v11, %v108_v11 }
  0x95   :  { %202 = vrot.lane.b32.xlu1 %v1186_v8, %s1087_s0  ;;  %227 = vrot.lane.b32.xlu2 %v1190_v12, %s1085_s1 }
  0x96   :  { %110 = vrot.lane.b32.xlu0 %v1190_v12, %s1086_s29 }
  0x9d   :  { %343 = vrot.lane.b32.xlu1 %v1190_v12, %s1088_s30  ;;  %225 = vrot.lane.b32.xlu2 %v1190_v12, %s1087_s0 }
  0x9e   :  { %320 = vrot.lane.b32.xlu0 %v1186_v8, %s1088_s30 }
  0xa5   :  { %436 = vrot.lane.b32.xlu1 %v1186_v8, %s1089_s13  ;;  %318 = vrot.lane.b32.xlu2 %v1186_v8, %s1090_s14 }
  0xa6   :  { %341 = vrot.lane.b32.xlu0 %v1190_v12, %s1090_s14 }
  0xad   :  { %457 = vrot.lane.b32.xlu1 %v1190_v12, %s1091_s15  ;;  %459 = vrot.lane.b32.xlu2 %v1190_v12, %s1089_s13 }
  0xae   :  { %434 = vrot.lane.b32.xlu0 %v1186_v8, %s1091_s15 }
  0xef   :  { %v228_v13 = vpop.permute.xlu2 %227 }
  0xf0   :  { %v233_v19 = vsel %vm87_vm1, %v228_v13, 0 }
  0xf7   :  { %v226_v18 = vpop.permute.xlu2 %225 }
  0xff   :  { %v205_v14 = vpop.permute.xlu1 %204  ;;  %v86_v15 = vpop.permute.xlu0 %85 }
 0x100   :  { %v92_v16 = vsel %vm87_vm1, %v86_v15, 0  ;;  %v210_v17 = vsel %vm87_vm1, %v205_v14, 0  ;;  %v319_v23 = vpop.permute.xlu2 %318 }
 0x101   :  { %101 = vmatpush.bf16.xpose.msra.mxu1 %v92_v16  ;;  %219 = vmatpush.bf16.xpose.msrb.mxu0 %v210_v17 }
 0x107   :  { %v203_v20 = vpop.permute.xlu1 %202 }
 0x108   :  { %v111_v21 = vpop.permute.xlu0 %110  ;;  %913 = vmatmul.msk.bf16.vlgmr.msra.gmra.mxu1 %vm87_vm1, %v80_v6  ;;  %917 = vmatmul.msk.bf16.vlgmr.msrb.gmra.mxu0 %vm87_vm1, %v203_v20  ;;  %v460_v28 = vpop.permute.xlu2 %459 }
 0x109   :  { %242 = vmatpush.bf16.xpose.msrb.mxu1 %v233_v19  ;;  %v116_v22 = vsel %vm87_vm1, %v111_v21, 0  ;;  %v465_v30 = vsel %vm87_vm1, %v460_v28, 0 }
 0x10a   :  { %125 = vmatpush.bf16.xpose.msra.mxu2 %v116_v22 }
 0x10f   :  { %v344_v24 = vpop.permute.xlu1 %343 }
 0x110   :  { %v349_v25 = vsel %vm87_vm1, %v344_v24, 0  ;;  %v321_v26 = vpop.permute.xlu0 %320 }
 0x111   :  { %v326_v27 = vsel %vm87_vm1, %v321_v26, 0  ;;  %914 = vmatmul.msk.bf16.vlgmr.msra.gmra.mxu2 %vm87_vm1, %v81_v10  ;;  %358 = vmatpush.bf16.xpose.msra.mxu1 %v349_v25 }
 0x112   :  { %335 = vmatpush.bf16.xpose.msra.mxu0 %v326_v27 }
 0x117   :  { %v437_v29 = vpop.permute.xlu1 %436 }
 0x118   :  { %v442_v31 = vsel %vm87_vm1, %v437_v29, 0  ;;  %918 = vmatmul.msk.bf16.vlgmr.msrb.gmra.mxu1 %vm87_vm1, %v226_v18  ;;  %v342_v32 = vpop.permute.xlu0 %341 }
 0x119   :  { %921 = vmatmul.msk.bf16.vlgmr.msra.gmra.mxu0 %vm87_vm1, %v319_v23  ;;  %474 = vmatpush.bf16.xpose.msrb.mxu1 %v465_v30 }
 0x11a   :  { %451 = vmatpush.bf16.xpose.msrb.mxu0 %v442_v31 }
 0x11f   :  { %v458_v34 = vpop.permute.xlu1 %457 }
 0x120   :  { %v435_v33 = vpop.permute.xlu0 %434 }
 0x128   :  { %922 = vmatmul.msk.bf16.vlgmr.msra.gmra.mxu1 %vm87_vm1, %v342_v32 }
 0x129   :  { %925 = vmatmul.msk.bf16.vlgmr.msrb.gmra.mxu0 %vm87_vm1, %v435_v33 }
 0x138   :  { %926 = vmatmul.msk.bf16.vlgmr.msrb.gmra.mxu1 %vm87_vm1, %v458_v34 }
 0x185   :  { %v103_v35 = vpop.f32.mrf.mxu1  ;;  %v221_v36 = vpop.f32.mrf.mxu0 }
 0x186   :  { %v131_v37 = vmul.f32 0.35355338, %v103_v35  ;;  %v248_v38 = vmul.f32 0.35355338, %v221_v36 }
 0x188   :  { %v250_v39 = vsel %vm87_vm1, %v248_v38, -inf  ;;  %v133_v40 = vsel %vm87_vm1, %v131_v37, -inf }
 0x189   :  { %251 = vmax.xlane.f32.xlu1 %v250_v39  ;;  %134 = vmax.xlane.f32.xlu2 %v133_v40 }
 0x18d   :  { %v105_v41 = vpop.f32.mrf.mxu1  ;;  %v223_v42 = vpop.f32.mrf.mxu0 }
 0x194   :  { %v127_v43 = vpop.f32.mrf.mxu2 }
 0x195   :  { %v132_v44 = vmul.f32 0.35355338, %v127_v43  ;;  %v244_v45 = vpop.f32.mrf.mxu1 }
 0x196   :  { %v1222_v46 = vmul.f32 0.35355338, %v244_v45  ;;  %v337_v47 = vpop.f32.mrf.mxu0 }
 0x197   :  { %v364_v48 = vmul.f32 0.35355338, %v337_v47  ;;  %v136_v49 = vsel %vm87_vm1, %v132_v44, -inf }
 0x198   :  { %137 = vmax.xlane.f32.xlu0 %v136_v49  ;;  %v253_v50 = vsel %vm87_vm1, %v1222_v46, -inf }
 0x199   :  { %254 = vmax.xlane.f32.xlu2 %v253_v50  ;;  %v366_v51 = vsel %vm87_vm1, %v364_v48, -inf }
 0x19a   :  { %367 = vmax.xlane.f32.xlu1 %v366_v51 }
 0x19c   :  { %v129_v52 = vpop.f32.mrf.mxu2 }
 0x19d   :  { %v246_v53 = vpop.f32.mrf.mxu1 }
 0x19e   :  { %v339_v54 = vpop.f32.mrf.mxu0 }
 0x1a5   :  { %v360_v55 = vpop.f32.mrf.mxu1 }
 0x1a6   :  { %v1228_v56 = vmul.f32 0.35355338, %v360_v55  ;;  %v453_v57 = vpop.f32.mrf.mxu0 }
 0x1a7   :  { %v480_v58 = vmul.f32 0.35355338, %v453_v57 }
 0x1a8   :  { %v369_v59 = vsel %vm87_vm1, %v1228_v56, -inf }
 0x1a9   :  { %370 = vmax.xlane.f32.xlu2 %v369_v59  ;;  %v482_v60 = vsel %vm87_vm1, %v480_v58, -inf }
 0x1aa   :  { %483 = vmax.xlane.f32.xlu1 %v482_v60 }
 0x1ac   :  { %157 = vrot.lane.b32.xlu0 %v1186_v8, %s1092_s16 }
 0x1ad   :  { %v362_v61 = vpop.f32.mrf.mxu1 }
 0x1ae   :  { %v455_v62 = vpop.f32.mrf.mxu0 }
 0x1b5   :  { %v476_v63 = vpop.f32.mrf.mxu1 }
 0x1b6   :  { %v1237_v1 = vmul.f32 0.35355338, %v476_v63 }
 0x1b8   :  { %v485_v4 = vsel %vm87_vm1, %v1237_v1, -inf }
 0x1bd   :  { %v478_v0 = vpop.f32.mrf.mxu1 }
 0x1c3   :  { %274 = vrot.lane.b32.xlu1 %v1186_v8, %s1093_s17 }
 0x1d6   :  { %486 = vmax.xlane.f32.xlu0 %v485_v4 }
 0x1ea   :  { %390 = vrot.lane.b32.xlu0 %v1186_v8, %s1094_s18 }
 0x1fc   :  { %v252_v5 = vpop.xlane.xlu1 %251  ;;  %v135_v6 = vpop.xlane.xlu2 %134 }
 0x1fd   :  { %v256_v7 = vsub.f32 %v248_v38, %v252_v5  ;;  %v139_v9 = vsub.f32 %v131_v37, %v135_v6 }
 0x1ff   :  { %v258_v10 = vmul.f32 1.442695, %v256_v7  ;;  %v141_v11 = vmul.f32 1.442695, %v139_v9 }
 0x201   :  { %1017 = vpow2.f32 %v258_v10 }
 0x202   :  { %1019 = vpow2.f32 %v141_v11 }
 0x207   :  { %v1243_v13 = vpop.eup %1017 }
 0x208   :  { %v1245_v14 = vpop.eup %1019  ;;  %v262_v15 = vsel %vm87_vm1, %v1243_v13, 0.0 }
 0x209   :  { %v145_v16 = vsel %vm87_vm1, %v1245_v14, 0.0  ;;  %263 = vadd.xlane.f32.xlu1 %v262_v15 }
 0x20a   :  { %146 = vadd.xlane.f32.xlu2 %v145_v16 }
 0x20b   :  { %v138_v17 = vpop.xlane.xlu0 %137 }
 0x20c   :  { %v140_v18 = vsub.f32 %v132_v44, %v138_v17  ;;  %v255_v34 = vpop.xlane.xlu2 %254 }
 0x20d   :  { %v368_v19 = vpop.xlane.xlu1 %367  ;;  %v257_v35 = vsub.f32 %v1222_v46, %v255_v34 }
 0x20e   :  { %v143_v20 = vmul.f32 1.442695, %v140_v18  ;;  %v372_v21 = vsub.f32 %v364_v48, %v368_v19 }
 0x20f   :  { %v260_v36 = vmul.f32 1.442695, %v257_v35 }
 0x210   :  { %1021 = vpow2.f32 %v143_v20  ;;  %v374_v22 = vmul.f32 1.442695, %v372_v21 }
 0x212   :  { %1023 = vpow2.f32 %v374_v22 }
 0x216   :  { %v1251_v23 = vpop.eup %1021 }
 0x217   :  { %v148_v24 = vsel %vm87_vm1, %v1251_v23, 0.0 }
 0x218   :  { %v1255_v25 = vpop.eup %1023  ;;  %149 = vadd.xlane.f32.xlu1 %v148_v24 }
 0x219   :  { %v378_v26 = vsel %vm87_vm1, %v1255_v25, 0.0 }
 0x21a   :  { %379 = vadd.xlane.f32.xlu0 %v378_v26 }
 0x21c   :  { %v371_v37 = vpop.xlane.xlu2 %370 }
 0x21d   :  { %v484_v27 = vpop.xlane.xlu1 %483  ;;  %v373_v39 = vsub.f32 %v1228_v56, %v371_v37 }
 0x21e   :  { %v488_v28 = vsub.f32 %v480_v58, %v484_v27  ;;  %v158_v29 = vpop.permute.xlu0 %157 }
 0x21f   :  { %v164_v30 = vsel %vm162_vm2, %v158_v29, 0  ;;  %v376_v41 = vmul.f32 1.442695, %v373_v39 }
 0x220   :  { %v490_v31 = vmul.f32 1.442695, %v488_v28  ;;  %173 = vmatpush.bf16.msra.mxu3 %v164_v30 }
 0x222   :  { %1025 = vpow2.f32 %v490_v31  ;;  %179 = vrot.lane.b32.xlu2 %v1190_v12, %s1092_s16 }
 0x223   :  { %1027 = vpow2.f32 %v260_v36 }
 0x224   :  { %1029 = vpow2.f32 %v376_v41 }
 0x228   :  { %v1262_v32 = vpop.eup %1025 }
 0x229   :  { %v494_v33 = vsel %vm87_vm1, %v1262_v32, 0.0  ;;  %v1028_v38 = vpop.eup %1027 }
 0x22a   :  { %495 = vadd.xlane.f32.xlu0 %v494_v33  ;;  %v265_v40 = vsel %vm87_vm1, %v1028_v38, 0.0  ;;  %v1272_v43 = vpop.eup %1029 }
 0x22b   :  { %v381_v44 = vsel %vm87_vm1, %v1272_v43, 0.0 }
 0x231   :  { %295 = vrot.lane.b32.xlu1 %v1190_v12, %s1093_s17 }
 0x235   :  { %v275_v48 = vpop.permute.xlu1 %274 }
 0x23e   :  { %527 = vrot.lane.b32.xlu0 %v1190_v12, %s1095_s19 }
 0x249   :  { %v487_v42 = vpop.xlane.xlu0 %486 }
 0x24a   :  { %v489_v47 = vsub.f32 %v1237_v1, %v487_v42 }
 0x24b   :  { %266 = vadd.xlane.f32.xlu2 %v265_v40 }
 0x24c   :  { %v492_v50 = vmul.f32 1.442695, %v489_v47 }
 0x25b   :  { %382 = vadd.xlane.f32.xlu1 %v381_v44 }
 0x25c   :  { %v391_v45 = vpop.permute.xlu0 %390 }
 0x25d   :  { %v396_v46 = vsel %vm162_vm2, %v391_v45, 0 }
 0x25e   :  { %405 = vmatpush.bf16.msrb.mxu2 %v396_v46 }
 0x263   :  { %411 = vrot.lane.b32.xlu2 %v1190_v12, %s1094_s18  ;;  %v280_v12 = vsel %vm162_vm2, %v275_v48, 0 }
 0x274   :  { %506 = vrot.lane.b32.xlu1 %v1186_v8, %s1095_s19 }
 0x27c   :  { %v264_v51 = vpop.xlane.xlu1 %263 }
 0x27d   :  { %v147_v49 = vpop.xlane.xlu2 %146 }
 0x27e   :  { %1031 = vrcp.f32 %v147_v49 }
 0x27f   :  { %1033 = vpow2.f32 %v492_v50 }
 0x284   :  { %v1032_v52 = vpop.eup %1031 }
 0x285   :  { %v180_v53 = vpop.permute.xlu2 %179  ;;  %v153_v54 = vmul.f32 %v1032_v52, %v1245_v14  ;;  %v1034_v57 = vpop.eup %1033 }
 0x286   :  { %v185_v55 = vsel %vm162_vm2, %v180_v53, 0  ;;  %v497_v58 = vsel %vm87_vm1, %v1034_v57, 0.0 }
 0x287   :  { %194 = vmatpush.bf16.msrb.mxu3 %v185_v55  ;;  %v155_v56 = vpack.c.bf16 %v153_v54, %v153_v54 }
 0x289   :  { %915 = vmatmul.msk.bf16.vlgmr.msra.gmra.mxu3 %vm87_vm1, %v155_v56 }
 0x28b   :  { %289 = vmatpush.bf16.msra.mxu3 %v280_v12  ;;  %v150_v8 = vpop.xlane.xlu1 %149 }
 0x28c   :  { %1035 = vrcp.f32 %v150_v8  ;;  %498 = vadd.xlane.f32.xlu2 %v497_v58 }
 0x28d   :  { %v380_v59 = vpop.xlane.xlu0 %379 }
 0x28e   :  { %1037 = vrcp.f32 %v380_v59 }
 0x28f   :  { %1039 = vrcp.f32 %v264_v51 }
 0x292   :  { %v1036_v60 = vpop.eup %1035 }
 0x293   :  { %v154_v61 = vmul.f32 %v1036_v60, %v1251_v23 }
 0x294   :  { %v1038_v62 = vpop.eup %1037 }
 0x295   :  { %v386_v63 = vmul.f32 %v1038_v62, %v1255_v25  ;;  %v156_v0 = vpack.c.bf16 %v154_v61, %v154_v61  ;;  %v1040_v4 = vpop.eup %1039 }
 0x296   :  { %v270_v5 = vmul.f32 %v1040_v4, %v1243_v13  ;;  %v981_v4 = vld [vmem:[%s1393_s2] sm:$0xff] }
 0x297   :  { %v388_v1 = vpack.c.bf16 %v386_v63, %v386_v63 }
 0x298   :  { %v272_v9 = vpack.c.bf16 %v270_v5, %v270_v5 }
 0x299   :  { %916 = vmatmul.msk.bf16.vlgmr.msrb.gmra.mxu3 %vm87_vm1, %v156_v0  ;;  %923 = vmatmul.msk.bf16.vlgmr.msrb.gmra.mxu2 %vm87_vm1, %v388_v1  ;;  %v982_v1 = vld [vmem:[%s1393_s2 + $0x8] sm:$0xff] }
 0x29a   :  { %630 = vmatpush.bf16.msra.mxu0 %v982_v1 }
 0x29d   :  { %v496_v11 = vpop.xlane.xlu0 %495 }
 0x29e   :  { %631 = vmatpush.bf16.msra.mxu0 %v981_v4 }
 0x2a3   :  { %v296_v6 = vpop.permute.xlu1 %295 }
 0x2a4   :  { %v301_v7 = vsel %vm162_vm2, %v296_v6, 0 }
 0x2a5   :  { %310 = vmatpush.bf16.msrb.mxu3 %v301_v7 }
 0x2a9   :  { %919 = vmatmul.msk.bf16.vlgmr.msra.gmra.mxu3 %vm87_vm1, %v272_v9 }
 0x2b0   :  { %v528_v17 = vpop.permute.xlu0 %527 }
 0x2b1   :  { %v533_v13 = vsel %vm162_vm2, %v528_v17, 0 }
 0x2be   :  { %v267_v10 = vpop.xlane.xlu2 %266 }
 0x2bf   :  { %1041 = vrcp.f32 %v267_v10 }
 0x2c5   :  { %v1042_v14 = vpop.eup %1041 }
 0x2c6   :  { %v271_v15 = vmul.f32 %v1042_v14, %v1028_v38  ;;  %v412_v16 = vpop.permute.xlu2 %411 }
 0x2c7   :  { %v417_v18 = vsel %vm162_vm2, %v412_v16, 0 }
 0x2c8   :  { %v273_v19 = vpack.c.bf16 %v271_v15, %v271_v15  ;;  %426 = vmatpush.bf16.msra.mxu3 %v417_v18 }
 0x2ca   :  { %920 = vmatmul.msk.bf16.vlgmr.msrb.gmra.mxu3 %vm87_vm1, %v273_v19 }
 0x2cc   :  { %542 = vmatpush.bf16.msrb.mxu3 %v533_v13 }
 0x2ce   :  { %v383_v20 = vpop.xlane.xlu1 %382 }
 0x2cf   :  { %1043 = vrcp.f32 %v383_v20 }
 0x2d0   :  { %1045 = vrcp.f32 %v496_v11 }
 0x2d5   :  { %v1044_v21 = vpop.eup %1043 }
 0x2d6   :  { %v387_v22 = vmul.f32 %v1044_v21, %v1272_v43  ;;  %v1046_v24 = vpop.eup %1045 }
 0x2d7   :  { %v502_v25 = vmul.f32 %v1046_v24, %v1262_v32  ;;  %v1010_v24 = vld [vmem:[%s1394_s3] ss:$0 sm:$0xff] }
 0x2d8   :  { %v389_v23 = vpack.c.bf16 %v387_v22, %v387_v22 }
 0x2d9   :  { %v504_v28 = vpack.c.bf16 %v502_v25, %v502_v25 }
 0x2da   :  { %924 = vmatmul.msk.bf16.vlgmr.msra.gmra.mxu3 %vm87_vm1, %v389_v23 }
 0x2e6   :  { %v507_v26 = vpop.permute.xlu1 %506 }
 0x2e7   :  { %v512_v27 = vsel %vm162_vm2, %v507_v26, 0 }
 0x2e8   :  { %521 = vmatpush.bf16.msra.mxu2 %v512_v27 }
 0x2eb   :  { %927 = vmatmul.msk.bf16.vlgmr.msra.gmra.mxu2 %vm87_vm1, %v504_v28 }
 0x2ff   :  { %v499_v29 = vpop.xlane.xlu2 %498 }
 0x300   :  { %1047 = vrcp.f32 %v499_v29 }
 0x306   :  { %v1048_v30 = vpop.eup %1047 }
 0x307   :  { %v503_v31 = vmul.f32 %v1048_v30, %v1034_v57 }
 0x309   :  { %v505_v33 = vpack.c.bf16 %v503_v31, %v503_v31 }
 0x30b   :  { %928 = vmatmul.msk.bf16.vlgmr.msrb.gmra.mxu3 %vm87_vm1, %v505_v33 }
 0x30c   :  { %v175_v34 = vpop.f32.mrf.mxu3 }
 0x30d   :  { %v200_v9 = vpack.c.bf16 %v175_v34, %v175_v34  ;;  %v1099_v34 = vmov 32.0  }
 0x30e   :  { %1049 = vrcp.f32 %v1099_v34  ;;  %v1014_v34 = vld [vmem:[%s1400_s9] ss:$0 sm:$0xff] }
 0x314   :  { %v177_v35 = vpop.f32.mrf.mxu3 }
 0x315   :  { %v1050_v35 = vpop.eup %1049 }
 0x316   :  { %vm653_vm5 = vweird.f32 %v1050_v35 }
 0x31c   :  { %v196_v36 = vpop.f32.mrf.mxu3  ;;  %v407_v37 = vpop.f32.mrf.mxu2 }
 0x31d   :  { %v432_v38 = vpack.c.bf16 %v407_v37, %v407_v37  ;;  %v201_v14 = vpack.c.bf16 %v196_v36, %v196_v36  ;;  %v649_v36 = vmul.f32 32.0, %v1050_v35 }
 0x31f   :  { %v562_v32 = vunpack.c.l.b16 %v432_v38  ;;  %v650_v37 = vsub.f32 1.0, %v649_v36 }
 0x321   :  { %v564_v39 = vpack.c.b16 %v562_v32, %v562_v32  ;;  %v651_v38 = vmul.f32 %v1050_v35, %v650_v37 }
 0x323   :  { %566 = vrot.lane.b32.xlu2 %v564_v39, %s1096_s20  ;;  %v652_v32 = vadd.f32 %v1050_v35, %v651_v38 }
 0x324   :  { %v198_v40 = vpop.f32.mrf.mxu3  ;;  %v409_v41 = vpop.f32.mrf.mxu2 }
 0x325   :  { %v1320_v39 = vsel %vm653_vm5, %v1050_v35, %v652_v32 }
 0x32c   :  { %v291_v42 = vpop.f32.mrf.mxu3 }
 0x32d   :  { %v316_v43 = vpack.c.bf16 %v291_v42, %v291_v42 }
 0x32f   :  { %v552_v44 = vunpack.c.l.b16 %v316_v43 }
 0x331   :  { %v554_v45 = vpack.c.b16 %v552_v44, %v552_v44 }
 0x333   :  { %556 = vrot.lane.b32.xlu1 %v554_v45, %s1097_s21 }
 0x334   :  { %v293_v46 = vpop.f32.mrf.mxu3 }
 0x34d   :  { %v312_v47 = vpop.f32.mrf.mxu3 }
 0x34e   :  { %v317_v48 = vpack.c.bf16 %v312_v47, %v312_v47 }
 0x350   :  { %v553_v49 = vunpack.c.l.b16 %v317_v48  ;;  %v984_v48 = vld [vmem:[%s1397_s6 + $0x8] sm:$0xff] }
 0x351   :  { %733 = vmatpush.bf16.msra.mxu1 %v984_v48 }
 0x352   :  { %v555_v50 = vpack.c.b16 %v553_v49, %v553_v49 }
 0x354   :  { %558 = vrot.lane.b32.xlu1 %v555_v50, %s1097_s21 }
 0x355   :  { %v314_v51 = vpop.f32.mrf.mxu3 }
 0x35d   :  { %v428_v52 = vpop.f32.mrf.mxu3 }
 0x35e   :  { %v433_v53 = vpack.c.bf16 %v428_v52, %v428_v52  ;;  %v983_v52 = vld [vmem:[%s1397_s6] sm:$0xff]  ;;  %s892_s6 = sshll.u32 %s1403_s12, 4  ;;  %s893_s6 = int_to_ptr.hbm [resolvable:$true] %s892_s6 }
 0x35f   :  { %734 = vmatpush.bf16.msra.mxu1 %v983_v52 }
 0x360   :  { %v563_v54 = vunpack.c.l.b16 %v433_v53  ;;  %v992_v53 = vld [vmem:[%s1399_s8 + $0x38] sm:$0xff] }
 0x361   :  { %812 = vmatpush.bf16.msrb.mxu2 %v992_v53 }
 0x362   :  { %v565_v55 = vpack.c.b16 %v563_v54, %v563_v54 }
 0x364   :  { %568 = vrot.lane.b32.xlu1 %v565_v55, %s1096_s20 }
 0x365   :  { %v430_v56 = vpop.f32.mrf.mxu3 }
 0x366   :  { %v991_v56 = vld [vmem:[%s1399_s8 + $0x30] sm:$0xff] }
 0x367   :  { %813 = vmatpush.bf16.msrb.mxu2 %v991_v56 }
 0x36e   :  { %v523_v57 = vpop.f32.mrf.mxu2 }
 0x36f   :  { %v548_v12 = vpack.c.bf16 %v523_v57, %v523_v57 }
 0x371   :  { %v572_v8 = vunpack.c.l.b16 %v548_v12 }
 0x373   :  { %v574_v58 = vpack.c.b16 %v572_v8, %v572_v8 }
 0x375   :  { %576 = vrot.lane.b32.xlu0 %v574_v58, %s1098_s22  ;;  %v990_v58 = vld [vmem:[%s1399_s8 + $0x28] sm:$0xff] }
 0x376   :  { %v525_v59 = vpop.f32.mrf.mxu2  ;;  %814 = vmatpush.bf16.msrb.mxu2 %v990_v58 }
 0x37d   :  { %v567_v15 = vpop.permute.xlu2 %566 }
 0x38e   :  { %v544_v60 = vpop.f32.mrf.mxu3 }
 0x38f   :  { %v549_v61 = vpack.c.bf16 %v544_v60, %v544_v60 }
 0x391   :  { %v573_v62 = vunpack.c.l.b16 %v549_v61  ;;  %v989_v61 = vld [vmem:[%s1399_s8 + $0x20] sm:$0xff] }
 0x392   :  { %815 = vmatpush.bf16.msrb.mxu2 %v989_v61 }
 0x393   :  { %v575_v63 = vpack.c.b16 %v573_v62, %v573_v62 }
 0x395   :  { %578 = vrot.lane.b32.xlu1 %v575_v63, %s1098_s22 }
 0x396   :  { %v546_v0 = vpop.f32.mrf.mxu3 }
 0x3a5   :  { %v557_v5 = vpop.permute.xlu1 %556 }
 0x3a6   :  { %v582_v10 = vsel %vm87_vm1, %v200_v9, %v557_v5  ;;  %v1011_v9 = vld [vmem:[%s1395_s4] ss:$0 sm:$0xff] }
 0x3a7   :  { %v588_v16 = vsel %vm586_vm3, %v582_v10, %v567_v15  ;;  %v1012_v15 = vld [vmem:[%s1396_s5] ss:$0 sm:$0xff] }
 0x3c6   :  { %v559_v6 = vpop.permute.xlu1 %558 }
 0x3c7   :  { %v585_v17 = vsel %vm87_vm1, %v201_v14, %v559_v6 }
 0x3d6   :  { %v569_v7 = vpop.permute.xlu1 %568 }
 0x3d7   :  { %v590_v19 = vsel %vm586_vm3, %v585_v17, %v569_v7 }
 0x3e7   :  { %v577_v11 = vpop.permute.xlu0 %576 }
 0x3e8   :  { %v593_v18 = vsel %vm591_vm4, %v588_v16, %v577_v11 }
 0x3e9   :  { %v606_v21 = vunpack.c.l.b16 %v593_v18 }
 0x407   :  { %v579_v13 = vpop.permute.xlu1 %578 }
 0x408   :  { %v595_v20 = vsel %vm591_vm4, %v590_v19, %v579_v13 }
 0x409   :  { %v607_v22 = vunpack.c.l.b16 %v595_v20 }
 0x40b   :  { %v608_v23 = vpack.c.b16 %v607_v22, %v606_v21  ;;  %v988_v21 = vld [vmem:[%s1399_s8 + $0x18] sm:$0xff]  ;;  %v987_v22 = vld [vmem:[%s1399_s8 + $0x10] sm:$0xff] }
 0x40c   :  { %816 = vmatpush.bf16.msrb.mxu2 %v988_v21 }
 0x40d   :  { %937 = vmatmul.msk.bf16.vlgmr.msra.gmra.mxu0 %vm62_vm0, %v608_v23  ;;  %v986_v23 = vld [vmem:[%s1399_s8 + $0x8] sm:$0xff] }
 0x410   :  { %817 = vmatpush.bf16.msrb.mxu2 %v987_v22 }
 0x414   :  { %818 = vmatpush.bf16.msrb.mxu2 %v986_v23 }
 0x48a   :  { %v633_v25 = vpop.f32.mrf.mxu0 }
 0x48b   :  { %v634_v26 = vadd.f32 %v1010_v24, %v633_v25 }
 0x48d   :  { %v638_v27 = vadd.f32 %v634_v26, %v1176_v2  ;;  %v1013_v26 = vld [vmem:[%s1398_s7] ss:$0 sm:$0xff] }
 0x48f   :  { %v642_v28 = vsel %vm62_vm0, %v638_v27, 0.0 }
 0x490   :  { %643 = vadd.xlane.f32.xlu0 %v642_v28 }
 0x492   :  { %v635_v29 = vpop.f32.mrf.mxu0 }
 0x493   :  { %v636_v30 = vadd.f32 %v1010_v24, %v635_v29  ;;  %v985_v24 = vld [vmem:[%s1399_s8] sm:$0xff] }
 0x494   :  { %819 = vmatpush.bf16.msrb.mxu2 %v985_v24 }
 0x495   :  { %v639_v31 = vadd.f32 %v636_v30, %v1181_v3 }
 0x497   :  { %v645_v33 = vsel %vm62_vm0, %v639_v31, 0.0 }
 0x498   :  { %646 = vadd.xlane.f32.xlu1 %v645_v33 }
 0x503   :  { %v644_v2 = vpop.xlane.xlu0 %643 }
 0x504   :  { %v655_v40 = vmul.f32 %v1320_v39, %v644_v2 }
 0x506   :  { %v657_v41 = vsub.f32 %v638_v27, %v655_v40 }
 0x508   :  { %v659_v42 = vmul.f32 %v657_v41, %v657_v41 }
 0x50a   :  { %v661_v3 = vsel %vm62_vm0, %v659_v42, 0.0 }
 0x50b   :  { %v647_v43 = vpop.xlane.xlu1 %646  ;;  %662 = vadd.xlane.f32.xlu2 %v661_v3 }
 0x50c   :  { %v656_v44 = vmul.f32 %v1320_v39, %v647_v43 }
 0x50e   :  { %v658_v45 = vsub.f32 %v639_v31, %v656_v44 }
 0x510   :  { %v660_v46 = vmul.f32 %v658_v45, %v658_v45 }
 0x512   :  { %v664_v47 = vsel %vm62_vm0, %v660_v46, 0.0 }
 0x513   :  { %665 = vadd.xlane.f32.xlu0 %v664_v47 }
 0x57e   :  { %v663_v49 = vpop.xlane.xlu2 %662 }
 0x57f   :  { %v667_v50 = vmul.f32 %v663_v49, %v1320_v39 }
 0x581   :  { %v669_v51 = vadd.f32 1e-05, %v667_v50 }
 0x583   :  { %1051 = vrsqrt.f32 %v669_v51  ;;  %vm677_vm7 = vweird.f32 %v669_v51 }
 0x586   :  { %v666_v54 = vpop.xlane.xlu0 %665 }
 0x587   :  { %v668_v55 = vmul.f32 %v666_v54, %v1320_v39 }
 0x589   :  { %v1052_v57 = vpop.eup %1051  ;;  %v670_v12 = vadd.f32 1e-05, %v668_v55 }
 0x58a   :  { %v672_v8 = vmul.f32 %v1052_v57, %v669_v51  ;;  %vm678_vm6 = vweird.f32 %v1052_v57 }
 0x58b   :  { %1053 = vrsqrt.f32 %v670_v12  ;;  %vm679_vm8 = vmor %vm677_vm7, %vm678_vm6  ;;  %vm687_vm10 = vweird.f32 %v670_v12 }
 0x58c   :  { %v673_v59 = vmul.f32 %v1052_v57, %v672_v8 }
 0x58e   :  { %v674_v60 = vmul.f32 0.5, %v673_v59 }
 0x590   :  { %v675_v62 = vsub.f32 1.5, %v674_v60 }
 0x591   :  { %v1054_v63 = vpop.eup %1053 }
 0x592   :  { %v676_v0 = vmul.f32 %v1052_v57, %v675_v62  ;;  %v682_v1 = vmul.f32 %v1054_v63, %v670_v12  ;;  %vm688_vm9 = vweird.f32 %v1054_v63 }
 0x593   :  { %vm689_vm11 = vmor %vm687_vm10, %vm688_vm9 }
 0x594   :  { %v683_v4 = vmul.f32 %v1054_v63, %v682_v1  ;;  %v680_v5 = vsel %vm679_vm8, %v1052_v57, %v676_v0 }
 0x595   :  { %v691_v10 = vmul.f32 %v680_v5, %v657_v41 }
 0x596   :  { %v684_v6 = vmul.f32 0.5, %v683_v4  ;;  %v1016_v4 = vld [vmem:[%s1402_s11] ss:$0 sm:$0xff]  ;;  %s1101_s11 = smov 128  }
 0x597   :  { %v696_v16 = vmul.f32 %v1011_v9, %v691_v10 }
 0x598   :  { %v685_v7 = vsub.f32 1.5, %v684_v6 }
 0x599   :  { %v701_v19 = vadd.f32 %v1012_v15, %v696_v16 }
 0x59a   :  { %v686_v11 = vmul.f32 %v1054_v63, %v685_v7 }
 0x59c   :  { %v690_v14 = vsel %vm689_vm11, %v1054_v63, %v686_v11  ;;  %v1015_v63 = vld [vmem:[%s1401_s10] ss:$0 sm:$0xff]  ;;  %s1100_s10 = smov [#allocation2]  }
 0x59d   :  { %v692_v17 = vmul.f32 %v690_v14, %v658_v45  ;;  %s890_s30 = sshll.u32 %s1100_s10, 4  ;;  %s891_s30 = int_to_ptr.vmem [resolvable:$true] %s890_s30 }
 0x59f   :  { %v697_v18 = vmul.f32 %v1011_v9, %v692_v17 }
 0x5a1   :  { %v702_v13 = vadd.f32 %v1012_v15, %v697_v18 }
 0x5a3   :  { %v703_v20 = vpack.c.bf16 %v702_v13, %v701_v19 }
 0x5a5   :  { %946 = vmatmul.msk.bf16.vlgmr.msra.gmra.mxu1 %vm62_vm0, %v703_v20 }
 0x622   :  { %v736_v25 = vpop.f32.mrf.mxu1 }
 0x623   :  { %v737_v27 = vadd.f32 %v1013_v26, %v736_v25 }
 0x625   :  { %v741_v30 = vmax.f32 %v737_v27, 0.0 }
 0x62a   :  { %v738_v28 = vpop.f32.mrf.mxu1 }
 0x62b   :  { %v739_v29 = vadd.f32 %v1013_v26, %v738_v28 }
 0x62d   :  { %v742_v31 = vmax.f32 %v739_v29, 0.0 }
 0x62f   :  { %v743_v33 = vpack.c.bf16 %v742_v31, %v741_v30 }
 0x631   :  { %820 = vmatmul.bf16.vlgmr.msrb.gmra.mxu2 %v743_v33 }
 0x6b4   :  { %v821_v35 = vpop.f32.mrf.mxu2 }
 0x6b5   :  { %v822_v36 = vadd.f32 %v1014_v34, %v821_v35 }
 0x6b7   :  { %v826_v37 = vadd.f32 %v822_v36, %v701_v19 }
 0x6b9   :  { %v830_v38 = vsel %vm62_vm0, %v826_v37, 0.0 }
 0x6ba   :  { %831 = vadd.xlane.f32.xlu1 %v830_v38 }
 0x6bc   :  { %v823_v32 = vpop.f32.mrf.mxu2 }
 0x6bd   :  { %v824_v2 = vadd.f32 %v1014_v34, %v823_v32 }
 0x6bf   :  { %v827_v40 = vadd.f32 %v824_v2, %v702_v13 }
 0x6c1   :  { %v833_v41 = vsel %vm62_vm0, %v827_v40, 0.0 }
 0x6c2   :  { %834 = vadd.xlane.f32.xlu0 %v833_v41 }
 0x72d   :  { %v832_v42 = vpop.xlane.xlu1 %831 }
 0x72e   :  { %v836_v3 = vmul.f32 %v832_v42, %v1320_v39 }
 0x730   :  { %v838_v43 = vsub.f32 %v826_v37, %v836_v3 }
 0x732   :  { %v840_v44 = vmul.f32 %v838_v43, %v838_v43 }
 0x734   :  { %v842_v45 = vsel %vm62_vm0, %v840_v44, 0.0 }
 0x735   :  { %v835_v46 = vpop.xlane.xlu0 %834  ;;  %843 = vadd.xlane.f32.xlu2 %v842_v45 }
 0x736   :  { %v837_v47 = vmul.f32 %v835_v46, %v1320_v39 }
 0x738   :  { %v839_v48 = vsub.f32 %v827_v40, %v837_v47 }
 0x73a   :  { %v841_v49 = vmul.f32 %v839_v48, %v839_v48 }
 0x73c   :  { %v845_v50 = vsel %vm62_vm0, %v841_v49, 0.0 }
 0x73d   :  { %846 = vadd.xlane.f32.xlu1 %v845_v50 }
 0x7a8   :  { %v844_v51 = vpop.xlane.xlu2 %843 }
 0x7a9   :  { %v848_v52 = vmul.f32 %v844_v51, %v1320_v39 }
 0x7ab   :  { %v850_v53 = vadd.f32 1e-05, %v848_v52 }
 0x7ad   :  { %1055 = vrsqrt.f32 %v850_v53  ;;  %vm858_vm13 = vweird.f32 %v850_v53 }
 0x7b0   :  { %v847_v54 = vpop.xlane.xlu1 %846 }
 0x7b1   :  { %v849_v55 = vmul.f32 %v847_v54, %v1320_v39 }
 0x7b3   :  { %v1056_v56 = vpop.eup %1055  ;;  %v851_v57 = vadd.f32 1e-05, %v849_v55 }
 0x7b4   :  { %v853_v12 = vmul.f32 %v1056_v56, %v850_v53  ;;  %vm859_vm12 = vweird.f32 %v1056_v56 }
 0x7b5   :  { %1057 = vrsqrt.f32 %v851_v57  ;;  %vm860_vm14 = vmor %vm858_vm13, %vm859_vm12  ;;  %vm868_vm1 = vweird.f32 %v851_v57 }
 0x7b6   :  { %v854_v8 = vmul.f32 %v1056_v56, %v853_v12 }
 0x7b8   :  { %v855_v58 = vmul.f32 0.5, %v854_v8 }
 0x7ba   :  { %v856_v59 = vsub.f32 1.5, %v855_v58 }
 0x7bb   :  { %v1058_v60 = vpop.eup %1057 }
 0x7bc   :  { %v857_v61 = vmul.f32 %v1056_v56, %v856_v59  ;;  %v863_v62 = vmul.f32 %v1058_v60, %v851_v57  ;;  %vm869_vm15 = vweird.f32 %v1058_v60 }
 0x7bd   :  { %vm870_vm2 = vmor %vm868_vm1, %vm869_vm15 }
 0x7be   :  { %v861_v0 = vsel %vm860_vm14, %v1056_v56, %v857_v61  ;;  %v864_v1 = vmul.f32 %v1058_v60, %v863_v62 }
 0x7bf   :  { %v872_v39 = vmul.f32 %v861_v0, %v838_v43 }
 0x7c0   :  { %v865_v5 = vmul.f32 0.5, %v864_v1 }
 0x7c1   :  { %v877_v6 = vmul.f32 %v1015_v63, %v872_v39 }
 0x7c2   :  { %v866_v7 = vsub.f32 1.5, %v865_v5 }
 0x7c3   :  { %v882_v9 = vadd.f32 %v1016_v4, %v877_v6 }
 0x7c4   :  { %v867_v10 = vmul.f32 %v1058_v60, %v866_v7 }
 0x7c5   :  { %884 = vst.msk [vmem:[#allocation2] sm:$0xff] %vm62_vm0, %v882_v9 }
 0x7c6   :  { %v871_v11 = vsel %vm870_vm2, %v1058_v60, %v867_v10 }
 0x7c7   :  { %v873_v14 = vmul.f32 %v871_v11, %v839_v48 }
 0x7c9   :  { %v878_v15 = vmul.f32 %v1015_v63, %v873_v14 }
 0x7cb   :  { %v883_v16 = vadd.f32 %v1016_v4, %v878_v15 }
 0x7cd   :  { %885 = vst.msk [vmem:[#allocation2 + $0x8] sm:$0xff] %vm62_vm0, %v883_v16 }
 0x7ce   :  { %898 = dma.vmem_to_hbm [thread:$0]  %s891_s30, 256, %s893_s6, [#allocation3], %s1101_s11, %s1101_s11, %s1097_s21  }
 0x7cf   :  { %1083 = dma.done.wait [#allocation3], 256  }
 0x7d0   :  { %1084 = vsyncadd [#allocation3], 4294967040 }
 0x7d1   :  { %903 = vsyncpa [#allocation3], 1 }

</bundles_post_ra>
